<compile_context>
chip_gen: v5e
topology: v5e:2x2
jax: 0.10.0
libtpu: 0.0.40
codegen_flags: <defaults>
</compile_context>

<pallas_src>
import functools

import jax
import jax.numpy as jnp
import numpy as np
from jax.experimental import pallas as pl
from jax.experimental.pallas import tpu as pltpu


# -----------------------------------------------------------------------------
# Pallas kernel: shared MLP (Linear->tanh->Linear->tanh) + fused 2-wide head,
# feature-major layout.  Processes one [state_dim, TB] batch tile per grid step;
# all weights are VMEM-resident via constant index_maps.
# -----------------------------------------------------------------------------
def actor_kernel(
    x_ref,      # [state_dim, TB]   VMEM (blocked over batch; batch on lanes)
    w1_ref,     # [128, state_dim]  VMEM (resident)
    b1_ref,     # [128, 1]          VMEM (resident)
    w2_ref,     # [64, 128]         VMEM (resident)
    b2_ref,     # [64, 1]           VMEM (resident)
    wh_ref,     # [2, 64]           VMEM (resident)  fused heads: row0=temp, row1=len
    bh_ref,     # [2, 1]            VMEM (resident)
    means_ref,  # [2, TB] out: row 0 = temp_mean, row 1 = len_mean
    *,
    compute_dtype,
):
    cd = compute_dtype
    x = x_ref[...].astype(cd)                                      # [state_dim, TB]

    # shared_layers: Linear -> tanh -> Linear -> tanh (f32 accumulation on MXU).
    h1 = jnp.tanh(
        (jnp.dot(w1_ref[...].astype(cd), x, preferred_element_type=jnp.float32)
         + b1_ref[...]).astype(cd)
    )                                                              # [128, TB]
    h2 = jnp.tanh(
        (jnp.dot(w2_ref[...].astype(cd), h1, preferred_element_type=jnp.float32)
         + b2_ref[...]).astype(cd)
    )                                                              # [64, TB]

    # fused heads: tanh(Linear(64 -> 2)); one MXU pass, one tanh, one dense store.
    means = jnp.tanh(
        jnp.dot(wh_ref[...].astype(cd), h2, preferred_element_type=jnp.float32)
        + bh_ref[...]
    )                                                              # [2, TB] f32
    means_ref[...] = means.astype(means_ref.dtype)


def _supports_native_bf16():
    """bf16 VPU/EUP/MXU only on v6e / v7x; keep f32 on v5e and earlier."""
    kind = jax.devices()[0].device_kind.lower()
    return ("v6" in kind) or ("v7" in kind)


# -----------------------------------------------------------------------------
# Wrapper
# -----------------------------------------------------------------------------
@functools.partial(jax.jit, static_argnames=("block_b", "use_bf16"))
def actor_forward(state, w1, b1, w2, b2, wh, bh, log_stds, *, block_b=8192,
                  use_bf16=None):
    if use_bf16 is None:
        use_bf16 = _supports_native_bf16()
    compute_dtype = jnp.bfloat16 if use_bf16 else jnp.float32

    B, state_dim = state.shape
    assert block_b % 128 == 0, "block_b must be a multiple of 128 (lane width)"

    # Feature-major: lanes carry the batch.  (Ideally callers hold `state` in
    # [state_dim, B] layout already; one relayout here beats a 16x lane-padding
    # blowup of the x tiles inside VMEM.)
    x = state.T                                                     # [state_dim, B]

    # Batch tiling (no jnp.pad copy; Pallas masks ragged edge blocks):
    if B > block_b:
        tb = block_b                                 # multiple of 128
    elif B >= 256:
        # >= 2 grid steps so both TensorCores get work on v7x.
        tb = pl.cdiv(pl.cdiv(B, 2), 128) * 128       # multiple of 128
    else:
        tb = B                                       # single full-extent block
    grid_b = pl.cdiv(B, tb)

    kernel = functools.partial(actor_kernel, compute_dtype=compute_dtype)

    means = pl.pallas_call(
        kernel,
        out_shape=jax.ShapeDtypeStruct((2, B), jnp.float32),
        grid=(grid_b,),
        in_specs=[
            pl.BlockSpec((state_dim, tb), lambda i: (0, i)),    # x (batch on lanes)
            pl.BlockSpec((128, state_dim), lambda i: (0, 0)),   # w1 (resident)
            pl.BlockSpec((128, 1), lambda i: (0, 0)),           # b1
            pl.BlockSpec((64, 128), lambda i: (0, 0)),          # w2
            pl.BlockSpec((64, 1), lambda i: (0, 0)),            # b2
            pl.BlockSpec((2, 64), lambda i: (0, 0)),            # fused head w
            pl.BlockSpec((2, 1), lambda i: (0, 0)),             # fused head b
        ],
        out_specs=pl.BlockSpec((2, tb), lambda i: (0, i)),
        compiler_params=pltpu.CompilerParams(
            dimension_semantics=("parallel",),
            # TODO(synk): evaluate pltpu.CORE_PARALLEL on the batch axis on v7x.
        ),
    )(x, w1, b1, w2, b2, wh, bh)

    means_t = means.T                                # [B, 2] (tiny relayout)
    temp_mean = means_t[:, 0:1]
    len_mean = means_t[:, 1:2]

    # std = exp(log_std) + eps is state-independent: one scalar exp each,
    # broadcast in the wrapper (no per-row EUP work, no extra store streams).
    eps = jnp.float32(1e-6)
    temp_std = jnp.broadcast_to(jnp.exp(log_stds[0]) + eps, (B, 1))
    len_std = jnp.broadcast_to(jnp.exp(log_stds[1]) + eps, (B, 1))

    return temp_mean, temp_std, len_mean, len_std


# -----------------------------------------------------------------------------
# Deterministic parameter initialization (matches PyTorch layer_init semantics:
# orthogonal weights with the given gain, constant bias = 0, log_std = 0).
# Weights are stored in the native PyTorch [out_features, in_features] layout;
# the two 64->1 heads are pre-fused into a single [2, 64] projection.
# -----------------------------------------------------------------------------
def init_params(key, state_dim):
    k1, k2, k3, k4 = jax.random.split(key, 4)
    ortho = jax.nn.initializers.orthogonal

    w1 = ortho(scale=np.sqrt(2))(k1, (128, state_dim), jnp.float32)
    b1 = jnp.zeros((128, 1), jnp.float32)
    w2 = ortho(scale=np.sqrt(2))(k2, (64, 128), jnp.float32)
    b2 = jnp.zeros((64, 1), jnp.float32)
    wt = ortho(scale=0.01)(k3, (1, 64), jnp.float32)
    wl = ortho(scale=0.01)(k4, (1, 64), jnp.float32)
    wh = jnp.concatenate([wt, wl], axis=0)            # [2, 64]: row0=temp, row1=len
    bh = jnp.zeros((2, 1), jnp.float32)
    log_stds = jnp.zeros((2,), jnp.float32)           # (temp_log_std, len_log_std)
    return w1, b1, w2, b2, wh, bh, log_stds


# Pure-JAX reference for a sanity check.
def actor_ref(state, w1, b1, w2, b2, wh, bh, log_stds):
    h1 = jnp.tanh(state @ w1.T + b1.T)
    h2 = jnp.tanh(h1 @ w2.T + b2.T)
    means = jnp.tanh(h2 @ wh.T + bh.T)                # [B, 2]
    temp_mean = means[:, 0:1]
    len_mean = means[:, 1:2]
    eps = 1e-6
    temp_std = jnp.full_like(temp_mean, jnp.exp(log_stds[0]) + eps)
    len_std = jnp.full_like(len_mean, jnp.exp(log_stds[1]) + eps)
    return temp_mean, temp_std, len_mean, len_std


if __name__ == "__main__":
    STATE_DIM = 8

    key = jax.random.PRNGKey(0)
    k_params, k_s1, k_s2, k_s3 = jax.random.split(key, 4)
    params = init_params(k_params, STATE_DIM)

    def _check(state, *, use_bf16, rtol, atol):
        outs = jax.block_until_ready(actor_forward(state, *params, use_bf16=use_bf16))
        refs = actor_ref(state, *params)
        for o, r in zip(outs, refs):
            np.testing.assert_allclose(np.asarray(o), np.asarray(r), rtol=rtol, atol=atol)

    # Case 1: tiny batch (single full-extent block).
    state_small = jax.random.normal(k_s1, (4, STATE_DIM), dtype=jnp.float32)
    _check(state_small, use_bf16=False, rtol=1e-5, atol=1e-5)

    # Case 2: odd batch, still a single full-extent block.
    state_mid = jax.random.normal(k_s2, (37, STATE_DIM), dtype=jnp.float32)
    _check(state_mid, use_bf16=False, rtol=1e-5, atol=1e-5)

    # Case 3: multi-block grid (>=2 steps) with a ragged, edge-masked final block.
    state_big = jax.random.normal(k_s3, (300, STATE_DIM), dtype=jnp.float32)
    _check(state_big, use_bf16=False, rtol=1e-5, atol=1e-5)

    # Case 4: bf16 compute path (only where bf16 VPU/EUP exist: v6e / v7x).
    if _supports_native_bf16():
        _check(state_big, use_bf16=True, rtol=3e-2, atol=3e-2)

    print("KERNEL_OK")
</pallas_src>

<mosaic_0001>
module attributes {stable_mosaic.version = 11 : i64} {
  func.func @actor_kernel(%arg0: i32, %arg1: memref<8x4xf32, #tpu.memory_space<vmem>>, %arg2: memref<128x8xf32, #tpu.memory_space<vmem>>, %arg3: memref<128x1xf32, #tpu.memory_space<vmem>>, %arg4: memref<64x128xf32, #tpu.memory_space<vmem>>, %arg5: memref<64x1xf32, #tpu.memory_space<vmem>>, %arg6: memref<2x64xf32, #tpu.memory_space<vmem>>, %arg7: memref<2x1xf32, #tpu.memory_space<vmem>>, %arg8: memref<2x4xf32, #tpu.memory_space<vmem>>) attributes {dimension_semantics = [#tpu.dimension_semantics<parallel>], iteration_bounds = array<i64: 1>, scalar_prefetch = 0 : i64, scratch_operands = 0 : i64, tpu.core_type = #tpu.core_type<tc>, window_params = [{transform_indices = @transform_0, window_bounds = array<i64: 8, 4>}, {pipeline_mode = #tpu.pipeline_mode<synchronous>, transform_indices = @transform_1, window_bounds = array<i64: 128, 8>}, {pipeline_mode = #tpu.pipeline_mode<synchronous>, transform_indices = @transform_2, window_bounds = array<i64: 128, 1>}, {pipeline_mode = #tpu.pipeline_mode<synchronous>, transform_indices = @transform_3, window_bounds = array<i64: 64, 128>}, {pipeline_mode = #tpu.pipeline_mode<synchronous>, transform_indices = @transform_4, window_bounds = array<i64: 64, 1>}, {pipeline_mode = #tpu.pipeline_mode<synchronous>, transform_indices = @transform_5, window_bounds = array<i64: 2, 64>}, {pipeline_mode = #tpu.pipeline_mode<synchronous>, transform_indices = @transform_6, window_bounds = array<i64: 2, 1>}, {transform_indices = @transform_7, window_bounds = array<i64: 2, 4>}]} {
    %c0 = arith.constant 0 : index
    %c0_0 = arith.constant 0 : index
    %0 = vector.load %arg1[%c0, %c0_0] : memref<8x4xf32, #tpu.memory_space<vmem>>, vector<8x4xf32>
    %c0_1 = arith.constant 0 : index
    %c0_2 = arith.constant 0 : index
    %1 = vector.load %arg2[%c0_1, %c0_2] : memref<128x8xf32, #tpu.memory_space<vmem>>, vector<128x8xf32>
    %cst = arith.constant dense<0.000000e+00> : vector<128x4xf32>
    %2 = tpu.matmul %1, %0, %cst {dimension_numbers = #tpu.dot_dimension_numbers<[1], [0], [0], [1], [0, 0, 1, 1], [], []>} : vector<128x8xf32>, vector<8x4xf32>, vector<128x4xf32> -> vector<128x4xf32>
    %c0_3 = arith.constant 0 : index
    %c0_4 = arith.constant 0 : index
    %3 = vector.load %arg3[%c0_3, %c0_4] : memref<128x1xf32, #tpu.memory_space<vmem>>, vector<128x1xf32>
    %4 = vector.broadcast %3 : vector<128x1xf32> to vector<128x4xf32>
    %5 = arith.addf %2, %4 : vector<128x4xf32>
    %6 = math.tanh %5 : vector<128x4xf32>
    %c0_5 = arith.constant 0 : index
    %c0_6 = arith.constant 0 : index
    %7 = vector.load %arg4[%c0_5, %c0_6] : memref<64x128xf32, #tpu.memory_space<vmem>>, vector<64x128xf32>
    %cst_7 = arith.constant dense<0.000000e+00> : vector<64x4xf32>
    %8 = tpu.matmul %7, %6, %cst_7 {dimension_numbers = #tpu.dot_dimension_numbers<[1], [0], [0], [1], [0, 0, 1, 1], [], []>} : vector<64x128xf32>, vector<128x4xf32>, vector<64x4xf32> -> vector<64x4xf32>
    %c0_8 = arith.constant 0 : index
    %c0_9 = arith.constant 0 : index
    %9 = vector.load %arg5[%c0_8, %c0_9] : memref<64x1xf32, #tpu.memory_space<vmem>>, vector<64x1xf32>
    %10 = vector.broadcast %9 : vector<64x1xf32> to vector<64x4xf32>
    %11 = arith.addf %8, %10 : vector<64x4xf32>
    %12 = math.tanh %11 : vector<64x4xf32>
    %c0_10 = arith.constant 0 : index
    %c0_11 = arith.constant 0 : index
    %13 = vector.load %arg6[%c0_10, %c0_11] : memref<2x64xf32, #tpu.memory_space<vmem>>, vector<2x64xf32>
    %cst_12 = arith.constant dense<0.000000e+00> : vector<2x4xf32>
    %14 = tpu.matmul %13, %12, %cst_12 {dimension_numbers = #tpu.dot_dimension_numbers<[1], [0], [0], [1], [0, 0, 1, 1], [], []>} : vector<2x64xf32>, vector<64x4xf32>, vector<2x4xf32> -> vector<2x4xf32>
    %c0_13 = arith.constant 0 : index
    %c0_14 = arith.constant 0 : index
    %15 = vector.load %arg7[%c0_13, %c0_14] : memref<2x1xf32, #tpu.memory_space<vmem>>, vector<2x1xf32>
    %16 = vector.broadcast %15 : vector<2x1xf32> to vector<2x4xf32>
    %17 = arith.addf %14, %16 : vector<2x4xf32>
    %18 = math.tanh %17 : vector<2x4xf32>
    %c0_15 = arith.constant 0 : index
    %c0_16 = arith.constant 0 : index
    %19 = vector.load %arg8[%c0_15, %c0_16] : memref<2x4xf32, #tpu.memory_space<vmem>>, vector<2x4xf32>
    tpu.vector_store %arg8[%c0_15, %c0_16], %18 {strides = array<i32>} : memref<2x4xf32, #tpu.memory_space<vmem>>, vector<2x4xf32>,
    return
  }
  func.func @transform_0(%arg0: i32) -> (i32, i32) {
    %c0_i32 = arith.constant 0 : i32
    %c0_i32_0 = arith.constant 0 : i32
    return %c0_i32, %arg0 : i32, i32
  }
  func.func @transform_1(%arg0: i32) -> (i32, i32) {
    %c0_i32 = arith.constant 0 : i32
    %c0_i32_0 = arith.constant 0 : i32
    %c0_i32_1 = arith.constant 0 : i32
    return %c0_i32, %c0_i32_0 : i32, i32
  }
  func.func @transform_2(%arg0: i32) -> (i32, i32) {
    %c0_i32 = arith.constant 0 : i32
    %c0_i32_0 = arith.constant 0 : i32
    %c0_i32_1 = arith.constant 0 : i32
    return %c0_i32, %c0_i32_0 : i32, i32
  }
  func.func @transform_3(%arg0: i32) -> (i32, i32) {
    %c0_i32 = arith.constant 0 : i32
    %c0_i32_0 = arith.constant 0 : i32
    %c0_i32_1 = arith.constant 0 : i32
    return %c0_i32, %c0_i32_0 : i32, i32
  }
  func.func @transform_4(%arg0: i32) -> (i32, i32) {
    %c0_i32 = arith.constant 0 : i32
    %c0_i32_0 = arith.constant 0 : i32
    %c0_i32_1 = arith.constant 0 : i32
    return %c0_i32, %c0_i32_0 : i32, i32
  }
  func.func @transform_5(%arg0: i32) -> (i32, i32) {
    %c0_i32 = arith.constant 0 : i32
    %c0_i32_0 = arith.constant 0 : i32
    %c0_i32_1 = arith.constant 0 : i32
    return %c0_i32, %c0_i32_0 : i32, i32
  }
  func.func @transform_6(%arg0: i32) -> (i32, i32) {
    %c0_i32 = arith.constant 0 : i32
    %c0_i32_0 = arith.constant 0 : i32
    %c0_i32_1 = arith.constant 0 : i32
    return %c0_i32, %c0_i32_0 : i32, i32
  }
  func.func @transform_7(%arg0: i32) -> (i32, i32) {
    %c0_i32 = arith.constant 0 : i32
    %c0_i32_0 = arith.constant 0 : i32
    return %c0_i32, %arg0 : i32, i32
  }
}

</mosaic_0001>

<bundles_post_ra>
// kernel: actor_forward.1
= control target key start
LH: loop header
LB: loop body
LE: loop exit
PB: predicated region body
PF: predicated region fallthrough
CT: control target
= control target key end

     0   :  { %vm139_vm0 = vcmask 64512   ;;  %v500_v0 = vmov 0   ;;  %vm381_vm1 = vcmask 523264   ;;  %vm406_vm2 = vcmask 25600   ;;  %s725_s2 = inlined_call_operand.vmem [shape: f32[128,1], index: 2, kind: input, shape index: {}]   ;;  %s726_s0 = inlined_call_operand.vmem [shape: f32[8,4], index: 0, kind: input, shape index: {}]   ;;  %s727_s1 = inlined_call_operand.vmem [shape: f32[128,8], index: 1, kind: input, shape index: {}]   ;;  %s728_s4 = inlined_call_operand.vmem [shape: f32[64,1], index: 4, kind: input, shape index: {}]   ;;  %s729_s6 = inlined_call_operand.vmem [shape: f32[2,1], index: 6, kind: input, shape index: {}]   ;;  %s730_s3 = inlined_call_operand.vmem [shape: f32[64,128], index: 3, kind: input, shape index: {}]   ;;  %s731_s5 = inlined_call_operand.vmem [shape: f32[2,64], index: 5, kind: input, shape index: {}]   ;;  %s732_s7 = inlined_call_operand.vmem [shape: f32[2,4], index: 7, kind: output, shape index: {}]  }
   0x1   :  { %447 = vset.pattern.permute.xlu0 %v500_v0  ;;  %v58_v1 = vld [vmem:[%s725_s2 + $0x78] sm:$0xff]  ;;  %v26_v2 = vld [vmem:[%s726_s0] sm:$0xff]  ;;  %448 = vset.pattern.permute.xlu1 %v500_v0  ;;  %v56_v4 = vld [vmem:[%s725_s2 + $0x68] sm:$0xff] }
   0x2   :  { %v35_v3 = vld [vmem:[%s727_s1 + $0x40] sm:$0xff]  ;;  %136 = vperm.xlu0 %447, %v58_v1   ;;  %429 = vmatpush.msra.mxu3 %v26_v2  ;;  %v57_v6 = vld [vmem:[%s725_s2 + $0x70] sm:$0xff]  ;;  %v54_v7 = vld [vmem:[%s725_s2 + $0x58] sm:$0xff] }
   0x3   :  { %v27_v5 = vld [vmem:[%s727_s1] sm:$0xff]  ;;  %420 = vmatmul.msk.f32.vlgmr.msra.gmra.mxu3 %vm139_vm0, %v35_v3  ;;  %126 = vperm.xlu1 %448, %v56_v4   ;;  %v36_v8 = vld [vmem:[%s727_s1 + $0x48] sm:$0xff]  ;;  %v53_v11 = vld [vmem:[%s725_s2 + $0x50] sm:$0xff] }
   0x4   :  { %203 = vmatpush.msra.mxu0 %v26_v2  ;;  %449 = vset.pattern.permute.xlu2 %v500_v0  ;;  %v55_v9 = vld [vmem:[%s725_s2 + $0x60] sm:$0xff]  ;;  %v28_v10 = vld [vmem:[%s727_s1 + $0x8] sm:$0xff]  ;;  %v37_v13 = vld [vmem:[%s727_s1 + $0x50] sm:$0xff] }
   0x5   :  { %412 = vmatmul.msk.f32.vlgmr.msra.gmra.mxu0 %vm139_vm0, %v27_v5  ;;  %116 = vperm.xlu2 %449, %v54_v7   ;;  %v52_v12 = vld [vmem:[%s725_s2 + $0x48] sm:$0xff]  ;;  %v51_v14 = vld [vmem:[%s725_s2 + $0x40] sm:$0xff]  ;;  %v29_v15 = vld [vmem:[%s727_s1 + $0x10] sm:$0xff] }
   0x6   :  { %v50_v16 = vld [vmem:[%s725_s2 + $0x38] sm:$0xff]  ;;  %v49_v17 = vld [vmem:[%s725_s2 + $0x30] sm:$0xff]  ;;  %v48_v19 = vld [vmem:[%s725_s2 + $0x28] sm:$0xff] }
   0x7   :  { %v38_v18 = vld [vmem:[%s727_s1 + $0x58] sm:$0xff]  ;;  %v47_v21 = vld [vmem:[%s725_s2 + $0x20] sm:$0xff]  ;;  %v45_v24 = vld [vmem:[%s725_s2 + $0x10] sm:$0xff] }
   0x8   :  { %v30_v20 = vld [vmem:[%s727_s1 + $0x18] sm:$0xff]  ;;  %v39_v23 = vld [vmem:[%s727_s1 + $0x60] sm:$0xff]  ;;  %v44_v26 = vld [vmem:[%s725_s2 + $0x8] sm:$0xff] }
   0x9   :  { %v46_v22 = vld [vmem:[%s725_s2 + $0x18] sm:$0xff]  ;;  %v31_v25 = vld [vmem:[%s727_s1 + $0x20] sm:$0xff]  ;;  %v40_v28 = vld [vmem:[%s727_s1 + $0x68] sm:$0xff] }
   0xa   :  { %131 = vperm.xlu0 %447, %v57_v6   ;;  %v43_v27 = vld [vmem:[%s725_s2] sm:$0xff]  ;;  %v284_v29 = vld [vmem:[%s728_s4 + $0x38] sm:$0xff]  ;;  %v32_v30 = vld [vmem:[%s727_s1 + $0x28] sm:$0xff] }
   0xb   :  { %421 = vmatmul.msk.f32.gmra.mxu3 %vm139_vm0, %v36_v8  ;;  %121 = vperm.xlu1 %448, %v55_v9   ;;  %v283_v31 = vld [vmem:[%s728_s4 + $0x30] sm:$0xff]  ;;  %v282_v32 = vld [vmem:[%s728_s4 + $0x28] sm:$0xff]  ;;  %v281_v34 = vld [vmem:[%s728_s4 + $0x20] sm:$0xff] }
   0xc   :  { %v41_v33 = vld [vmem:[%s727_s1 + $0x70] sm:$0xff]  ;;  %v280_v36 = vld [vmem:[%s728_s4 + $0x18] sm:$0xff]  ;;  %v278_v39 = vld [vmem:[%s728_s4 + $0x8] sm:$0xff] }
   0xd   :  { %413 = vmatmul.msk.f32.gmra.mxu0 %vm139_vm0, %v28_v10  ;;  %111 = vperm.xlu2 %449, %v53_v11   ;;  %v33_v35 = vld [vmem:[%s727_s1 + $0x30] sm:$0xff]  ;;  %v42_v38 = vld [vmem:[%s727_s1 + $0x78] sm:$0xff]  ;;  %v277_v41 = vld [vmem:[%s728_s4] sm:$0xff] }
   0xe   :  { %v279_v37 = vld [vmem:[%s728_s4 + $0x10] sm:$0xff]  ;;  %v34_v40 = vld [vmem:[%s727_s1 + $0x38] sm:$0xff]  ;;  %v375_v42 = vld [vmem:[%s729_s6] sm:$0x3] }
  0x12   :  { %106 = vperm.xlu0 %447, %v52_v12  }
  0x13   :  { %422 = vmatmul.msk.f32.gmra.mxu3 %vm139_vm0, %v37_v13  ;;  %101 = vperm.xlu1 %448, %v51_v14  }
  0x15   :  { %414 = vmatmul.msk.f32.gmra.mxu0 %vm139_vm0, %v29_v15  ;;  %96 = vperm.xlu2 %449, %v50_v16  }
  0x1a   :  { %91 = vperm.xlu0 %447, %v49_v17  }
  0x1b   :  { %423 = vmatmul.msk.f32.gmra.mxu3 %vm139_vm0, %v38_v18  ;;  %86 = vperm.xlu1 %448, %v48_v19  }
  0x1d   :  { %415 = vmatmul.msk.f32.gmra.mxu0 %vm139_vm0, %v30_v20  ;;  %81 = vperm.xlu2 %449, %v47_v21  }
  0x22   :  { %76 = vperm.xlu0 %447, %v46_v22  }
  0x23   :  { %424 = vmatmul.msk.f32.gmra.mxu3 %vm139_vm0, %v39_v23  ;;  %71 = vperm.xlu1 %448, %v45_v24  }
  0x25   :  { %416 = vmatmul.msk.f32.gmra.mxu0 %vm139_vm0, %v31_v25  ;;  %66 = vperm.xlu2 %449, %v44_v26  }
  0x2a   :  { %61 = vperm.xlu0 %447, %v43_v27  }
  0x2b   :  { %425 = vmatmul.msk.f32.gmra.mxu3 %vm139_vm0, %v40_v28  ;;  %322 = vperm.xlu1 %448, %v284_v29  }
  0x2d   :  { %417 = vmatmul.msk.f32.gmra.mxu0 %vm139_vm0, %v32_v30  ;;  %317 = vperm.xlu2 %449, %v283_v31  }
  0x32   :  { %312 = vperm.xlu0 %447, %v282_v32  }
  0x33   :  { %426 = vmatmul.msk.f32.gmra.mxu3 %vm139_vm0, %v41_v33  ;;  %307 = vperm.xlu1 %448, %v281_v34  }
  0x35   :  { %418 = vmatmul.msk.f32.gmra.mxu0 %vm139_vm0, %v33_v35  ;;  %302 = vperm.xlu2 %449, %v280_v36  }
  0x3a   :  { %297 = vperm.xlu0 %447, %v279_v37  }
  0x3b   :  { %427 = vmatmul.msk.f32.gmra.mxu3 %vm139_vm0, %v42_v38  ;;  %292 = vperm.xlu1 %448, %v278_v39  }
  0x3d   :  { %419 = vmatmul.msk.f32.gmra.mxu0 %vm139_vm0, %v34_v40  ;;  %287 = vperm.xlu2 %449, %v277_v41  }
  0x42   :  { %378 = vperm.xlu0 %447, %v375_v42   ;;  %v269_v42 = vld [vmem:[%s730_s3] sm:$0xff] }
  0x5f   :  { %v117_v54 = vpop.permute.xlu2 %116 }
  0x67   :  { %v112_v60 = vpop.permute.xlu2 %111 }
  0x6f   :  { %v97_v4 = vpop.permute.xlu2 %96 }
  0x74   :  { %v137_v51 = vpop.permute.xlu0 %136 }
  0x75   :  { %v127_v56 = vpop.permute.xlu1 %126 }
  0x77   :  { %v82_v16 = vpop.permute.xlu2 %81 }
  0x7c   :  { %v132_v57 = vpop.permute.xlu0 %131 }
  0x7d   :  { %v122_v61 = vpop.permute.xlu1 %121 }
  0x7f   :  { %v67_v29 = vpop.permute.xlu2 %66 }
  0x82   :  { %v683_v43 = vpop.f32.mrf.mxu0 }
  0x84   :  { %v107_v62 = vpop.permute.xlu0 %106 }
  0x85   :  { %v102_v6 = vpop.permute.xlu1 %101 }
  0x86   :  { %v229_v44 = vpop.f32.mrf.mxu3 }
  0x87   :  { %v230_v15 = vadd.f32 %v229_v44, %v102_v6 }
  0x8a   :  { %v685_v45 = vpop.f32.mrf.mxu0 }
  0x8b   :  { %v209_v35 = vadd.f32 %v685_v45, %v67_v29  ;;  %v270_v45 = vld [vmem:[%s730_s3 + $0x8] sm:$0xff] }
  0x8c   :  { %v92_v7 = vpop.permute.xlu0 %91 }
  0x8d   :  { %v87_v17 = vpop.permute.xlu1 %86 }
  0x8e   :  { %v232_v46 = vpop.f32.mrf.mxu3 }
  0x8f   :  { %v233_v12 = vadd.f32 %v232_v46, %v107_v62  ;;  %v275_v46 = vld [vmem:[%s730_s3 + $0x30] sm:$0xff] }
  0x92   :  { %v687_v48 = vpop.f32.mrf.mxu0 }
  0x94   :  { %v77_v20 = vpop.permute.xlu0 %76 }
  0x95   :  { %v72_v30 = vpop.permute.xlu1 %71 }
  0x96   :  { %v235_v47 = vpop.f32.mrf.mxu3  ;;  %v212_v32 = vadd.f32 %v687_v48, %v72_v30  ;;  %v276_v48 = vld [vmem:[%s730_s3 + $0x38] sm:$0xff] }
  0x97   :  { %v236_v10 = vadd.f32 %v235_v47, %v112_v60  ;;  %v271_v47 = vld [vmem:[%s730_s3 + $0x10] sm:$0xff] }
  0x9a   :  { %v689_v50 = vpop.f32.mrf.mxu0 }
  0x9b   :  { %v215_v28 = vadd.f32 %v689_v50, %v77_v20  ;;  %v273_v50 = vld [vmem:[%s730_s3 + $0x20] sm:$0xff] }
  0x9c   :  { %v62_v33 = vpop.permute.xlu0 %61 }
  0x9d   :  { %v206_v37 = vadd.f32 %v683_v43, %v62_v33  ;;  %v274_v43 = vld [vmem:[%s730_s3 + $0x28] sm:$0xff] }
  0x9e   :  { %v238_v49 = vpop.f32.mrf.mxu3 }
  0x9f   :  { %v239_v8 = vadd.f32 %v238_v49, %v117_v54  ;;  %v272_v49 = vld [vmem:[%s730_s3 + $0x18] sm:$0xff] }
  0xa2   :  { %v217_v53 = vpop.f32.mrf.mxu0 }
  0xa3   :  { %v218_v26 = vadd.f32 %v217_v53, %v82_v16 }
  0xa6   :  { %v241_v52 = vpop.f32.mrf.mxu3 }
  0xa7   :  { %v242_v5 = vadd.f32 %v241_v52, %v122_v61  ;;  %v313_v61 = vpop.permute.xlu0 %312 }
  0xaa   :  { %v220_v58 = vpop.f32.mrf.mxu0 }
  0xab   :  { %v221_v24 = vadd.f32 %v220_v58, %v87_v17 }
  0xae   :  { %v244_v55 = vpop.f32.mrf.mxu3 }
  0xaf   :  { %v245_v3 = vadd.f32 %v244_v55, %v127_v56  ;;  %v323_v55 = vpop.permute.xlu1 %322 }
  0xb2   :  { %v223_v2 = vpop.f32.mrf.mxu0 }
  0xb3   :  { %v224_v22 = vadd.f32 %v223_v2, %v92_v7  ;;  %v298_v7 = vpop.permute.xlu0 %297 }
  0xb6   :  { %v247_v59 = vpop.f32.mrf.mxu3 }
  0xb7   :  { %v248_v0 = vadd.f32 %v247_v59, %v132_v57  ;;  %v318_v57 = vpop.permute.xlu2 %317 }
  0xba   :  { %v226_v13 = vpop.f32.mrf.mxu0 }
  0xbb   :  { %v227_v19 = vadd.f32 %v226_v13, %v97_v4  ;;  %v379_v20 = vpop.permute.xlu0 %378 }
  0xbe   :  { %v250_v63 = vpop.f32.mrf.mxu3 }
  0xbf   :  { %v251_v1 = vadd.f32 %v250_v63, %v137_v51 }
  0xc1   :  { %450 = vtanh.f32 %v251_v1  ;;  %v303_v1 = vpop.permute.xlu2 %302 }
  0xc2   :  { %452 = vtanh.f32 %v248_v0  ;;  %v308_v0 = vpop.permute.xlu1 %307 }
  0xc3   :  { %454 = vtanh.f32 %v245_v3 }
  0xc4   :  { %456 = vtanh.f32 %v242_v5 }
  0xc5   :  { %458 = vtanh.f32 %v239_v8 }
  0xc6   :  { %460 = vtanh.f32 %v236_v10 }
  0xc7   :  { %v451_v9 = vpop.eup %450  ;;  %462 = vtanh.f32 %v233_v12 }
  0xc8   :  { %325 = vmatpush.msra.mxu1 %v451_v9  ;;  %430 = vmatpush.msra.mxu2 %v451_v9  ;;  %v453_v11 = vpop.eup %452  ;;  %464 = vtanh.f32 %v230_v15 }
  0xc9   :  { %v455_v14 = vpop.eup %454  ;;  %466 = vtanh.f32 %v227_v19  ;;  %v288_v12 = vpop.permute.xlu2 %287 }
  0xca   :  { %326 = vmatpush.msra.mxu1 %v453_v11  ;;  %431 = vmatpush.msra.mxu2 %v453_v11  ;;  %v457_v18 = vpop.eup %456  ;;  %468 = vtanh.f32 %v224_v22  ;;  %v293_v10 = vpop.permute.xlu1 %292 }
  0xcb   :  { %v459_v21 = vpop.eup %458  ;;  %470 = vtanh.f32 %v221_v24 }
  0xcc   :  { %327 = vmatpush.msra.mxu1 %v455_v14  ;;  %432 = vmatpush.msra.mxu2 %v455_v14  ;;  %v461_v23 = vpop.eup %460  ;;  %472 = vtanh.f32 %v218_v26 }
  0xcd   :  { %v463_v25 = vpop.eup %462  ;;  %474 = vtanh.f32 %v215_v28 }
  0xce   :  { %328 = vmatpush.msra.mxu1 %v457_v18  ;;  %433 = vmatpush.msra.mxu2 %v457_v18  ;;  %v465_v27 = vpop.eup %464  ;;  %476 = vtanh.f32 %v212_v32  ;;  %v374_v18 = vld [vmem:[%s731_s5] sm:$0x3] }
  0xcf   :  { %v467_v31 = vpop.eup %466  ;;  %478 = vtanh.f32 %v209_v35 }
  0xd0   :  { %329 = vmatpush.msra.mxu1 %v459_v21  ;;  %434 = vmatpush.msra.mxu2 %v459_v21  ;;  %v469_v34 = vpop.eup %468  ;;  %480 = vtanh.f32 %v206_v37 }
  0xd1   :  { %v471_v36 = vpop.eup %470 }
  0xd2   :  { %330 = vmatpush.msra.mxu1 %v461_v23  ;;  %435 = vmatpush.msra.mxu2 %v461_v23  ;;  %v473_v38 = vpop.eup %472 }
  0xd3   :  { %v475_v39 = vpop.eup %474 }
  0xd4   :  { %331 = vmatpush.msra.mxu1 %v463_v25  ;;  %436 = vmatpush.msra.mxu2 %v463_v25  ;;  %v477_v40 = vpop.eup %476 }
  0xd5   :  { %v479_v41 = vpop.eup %478 }
  0xd6   :  { %332 = vmatpush.msra.mxu1 %v465_v27  ;;  %437 = vmatpush.msra.mxu2 %v465_v27  ;;  %v481_v44 = vpop.eup %480 }
  0xd8   :  { %333 = vmatpush.msra.mxu1 %v467_v31  ;;  %438 = vmatpush.msra.mxu2 %v467_v31 }
  0xda   :  { %334 = vmatpush.msra.mxu1 %v469_v34  ;;  %439 = vmatpush.msra.mxu2 %v469_v34 }
  0xdc   :  { %335 = vmatpush.msra.mxu1 %v471_v36  ;;  %440 = vmatpush.msra.mxu2 %v471_v36 }
  0xde   :  { %336 = vmatpush.msra.mxu1 %v473_v38  ;;  %441 = vmatpush.msra.mxu2 %v473_v38 }
  0xe0   :  { %337 = vmatpush.msra.mxu1 %v475_v39  ;;  %442 = vmatpush.msra.mxu2 %v475_v39 }
  0xe2   :  { %338 = vmatpush.msra.mxu1 %v477_v40  ;;  %443 = vmatpush.msra.mxu2 %v477_v40 }
  0xe4   :  { %339 = vmatpush.msra.mxu1 %v479_v41  ;;  %444 = vmatpush.msra.mxu2 %v479_v41 }
  0xe6   :  { %340 = vmatpush.msra.mxu1 %v481_v44  ;;  %445 = vmatpush.msra.mxu2 %v481_v44 }
  0xe7   :  { %341 = vmatmul.f32.vlgmr.msra.gmra.mxu1 %v269_v42  ;;  %356 = vmatmul.f32.vlgmr.msra.gmra.mxu2 %v274_v43 }
  0xef   :  { %344 = vmatmul.f32.gmra.mxu1 %v270_v45  ;;  %359 = vmatmul.f32.gmra.mxu2 %v275_v46 }
  0xf7   :  { %347 = vmatmul.f32.gmra.mxu1 %v271_v47  ;;  %362 = vmatmul.f32.gmra.mxu2 %v276_v48 }
  0xff   :  { %350 = vmatmul.f32.gmra.mxu1 %v272_v49 }
 0x107   :  { %353 = vmatmul.f32.gmra.mxu1 %v273_v50 }
 0x164   :  { %v342_v51 = vpop.f32.mrf.mxu1 }
 0x165   :  { %v343_v13 = vadd.f32 %v342_v51, %v288_v12 }
 0x16a   :  { %v357_v52 = vpop.f32.mrf.mxu2 }
 0x16b   :  { %v358_v63 = vadd.f32 %v357_v52, %v313_v61 }
 0x16c   :  { %v345_v53 = vpop.f32.mrf.mxu1 }
 0x16d   :  { %v346_v11 = vadd.f32 %v345_v53, %v293_v10 }
 0x172   :  { %v360_v54 = vpop.f32.mrf.mxu2 }
 0x173   :  { %v361_v59 = vadd.f32 %v360_v54, %v318_v57 }
 0x174   :  { %v348_v56 = vpop.f32.mrf.mxu1 }
 0x175   :  { %v349_v9 = vadd.f32 %v348_v56, %v298_v7 }
 0x17a   :  { %v363_v58 = vpop.f32.mrf.mxu2 }
 0x17b   :  { %v364_v60 = vadd.f32 %v363_v58, %v323_v55 }
 0x17c   :  { %v351_v62 = vpop.f32.mrf.mxu1 }
 0x17d   :  { %482 = vtanh.f32 %v364_v60  ;;  %v352_v5 = vadd.f32 %v351_v62, %v303_v1 }
 0x17e   :  { %484 = vtanh.f32 %v361_v59 }
 0x17f   :  { %486 = vtanh.f32 %v358_v63 }
 0x183   :  { %v483_v2 = vpop.eup %482 }
 0x184   :  { %v354_v3 = vpop.f32.mrf.mxu1  ;;  %393 = vmatpush.msrb.mxu2 %v483_v2  ;;  %v485_v4 = vpop.eup %484 }
 0x185   :  { %v355_v6 = vadd.f32 %v354_v3, %v308_v0  ;;  %v487_v8 = vpop.eup %486 }
 0x186   :  { %394 = vmatpush.msrb.mxu2 %v485_v4 }
 0x187   :  { %488 = vtanh.f32 %v355_v6 }
 0x188   :  { %395 = vmatpush.msrb.mxu2 %v487_v8  ;;  %490 = vtanh.f32 %v352_v5 }
 0x189   :  { %492 = vtanh.f32 %v349_v9 }
 0x18a   :  { %494 = vtanh.f32 %v346_v11 }
 0x18b   :  { %496 = vtanh.f32 %v343_v13 }
 0x18d   :  { %v489_v14 = vpop.eup %488 }
 0x18e   :  { %396 = vmatpush.msrb.mxu2 %v489_v14  ;;  %v491_v15 = vpop.eup %490 }
 0x18f   :  { %v493_v16 = vpop.eup %492 }
 0x190   :  { %397 = vmatpush.msrb.mxu2 %v491_v15  ;;  %v495_v17 = vpop.eup %494 }
 0x191   :  { %v497_v19 = vpop.eup %496 }
 0x192   :  { %398 = vmatpush.msrb.mxu2 %v493_v16 }
 0x194   :  { %399 = vmatpush.msrb.mxu2 %v495_v17 }
 0x196   :  { %400 = vmatpush.msrb.mxu2 %v497_v19 }
 0x197   :  { %428 = vmatmul.msk.f32.vlgmr.msrb.gmra.mxu2 %vm381_vm1, %v374_v18 }
 0x21a   :  { %v402_v21 = vpop.f32.mrf.mxu2 }
 0x21b   :  { %v403_v22 = vadd.f32 %v402_v21, %v379_v20 }
 0x21d   :  { %498 = vtanh.f32 %v403_v22 }
 0x223   :  { %v499_v23 = vpop.eup %498 }
 0x224   :  { %407 = vst.msk [vmem:[%s732_s7] sm:$0x3] %vm406_vm2, %v499_v23 }

</bundles_post_ra>
